<compile_context>
chip_gen: v7x
topology: tpu7x:2x2x1
jax: 0.10.0
libtpu: 0.0.40
codegen_flags: <defaults>
</compile_context>

<pallas_src>
import functools

import jax
import jax.numpy as jnp
from jax.experimental import pallas as pl
from jax.experimental.pallas import tpu as pltpu

LEAKY_SLOPE = 0.2
BN_EPS = 1e-5
_VMEM_LIMIT = 48 << 20  # <= 48 MiB: safe on v5e/v6e (128 MiB) and v7x (64 MiB)


def _round_up(x, m):
    return ((x + m - 1) // m) * m


def _cparams(dims):
    return pltpu.CompilerParams(dimension_semantics=dims,
                                vmem_limit_bytes=_VMEM_LIMIT)


# ----------------------------- Pallas kernels ------------------------------

def _conv_gemm_act_kernel(a_ref, w_ref, scale_ref, shift_ref, o_ref, acc_ref,
                          *, act):
    """o = act((A @ W) * scale + shift); grid = (j, i, k), K reduction on k."""
    k = pl.program_id(2)
    nk = pl.num_programs(2)

    @pl.when(k == 0)
    def _():
        acc_ref[...] = jnp.zeros_like(acc_ref)

    acc_ref[...] += jnp.dot(a_ref[...], w_ref[...],
                            preferred_element_type=jnp.float32)

    @pl.when(k == nk - 1)
    def _():
        y = acc_ref[...] * scale_ref[...] + shift_ref[...]
        if act == "leaky":
            y = jnp.maximum(y, LEAKY_SLOPE * y)
        o_ref[...] = y.astype(o_ref.dtype)


def _conv_gemm_stats_kernel(a_ref, w_ref, o_ref, sum_ref, sq_ref, acc_ref):
    """Raw conv GEMM + fused per-column sum / sum-of-squares (for BatchNorm)."""
    i = pl.program_id(1)
    k = pl.program_id(2)
    nk = pl.num_programs(2)

    @pl.when(jnp.logical_and(i == 0, k == 0))
    def _():
        sum_ref[...] = jnp.zeros_like(sum_ref)
        sq_ref[...] = jnp.zeros_like(sq_ref)

    @pl.when(k == 0)
    def _():
        acc_ref[...] = jnp.zeros_like(acc_ref)

    acc_ref[...] += jnp.dot(a_ref[...], w_ref[...],
                            preferred_element_type=jnp.float32)

    @pl.when(k == nk - 1)
    def _():
        y = acc_ref[...]
        sum_ref[...] += jnp.sum(y, axis=0, keepdims=True)
        sq_ref[...] += jnp.sum(y * y, axis=0, keepdims=True)
        o_ref[...] = y.astype(o_ref.dtype)


def _affine_leaky_kernel(x_ref, scale_ref, shift_ref, o_ref):
    """o = leaky_relu(x * scale + shift) (folded BatchNorm affine)."""
    y = x_ref[...].astype(jnp.float32) * scale_ref[...] + shift_ref[...]
    o_ref[...] = jnp.maximum(y, LEAKY_SLOPE * y).astype(o_ref.dtype)


def _final_logit_stats_kernel(a_ref, w_ref, b_ref, sum_ref, hr_ref, hf_ref,
                              acc_ref, *, true_m, tm):
    """Final 1-channel conv fused with logit statistics.

    Accumulates sum(logit), sum(relu(1 - logit)), sum(relu(1 + logit)) over
    all output pixels; the [M, 1] logit map never leaves VMEM.
    """
    i = pl.program_id(0)
    k = pl.program_id(1)
    nk = pl.num_programs(1)

    @pl.when(jnp.logical_and(i == 0, k == 0))
    def _():
        sum_ref[...] = jnp.zeros_like(sum_ref)
        hr_ref[...] = jnp.zeros_like(hr_ref)
        hf_ref[...] = jnp.zeros_like(hf_ref)

    @pl.when(k == 0)
    def _():
        acc_ref[...] = jnp.zeros_like(acc_ref)

    prod = a_ref[...].astype(jnp.float32) * w_ref[...]          # VPU
    acc_ref[...] += jnp.sum(prod, axis=1, keepdims=True)        # XLU lane reduce

    @pl.when(k == nk - 1)
    def _():
        logit = acc_ref[...] + b_ref[0, 0]
        rows = jax.lax.broadcasted_iota(jnp.int32, logit.shape, 0) + i * tm
        valid = rows < true_m
        zero = jnp.zeros_like(logit)
        sum_ref[...] += jnp.sum(jnp.where(valid, logit, zero), keepdims=True)
        hr_ref[...] += jnp.sum(
            jnp.where(valid, jnp.maximum(0.0, 1.0 - logit), zero), keepdims=True)
        hf_ref[...] += jnp.sum(
            jnp.where(valid, jnp.maximum(0.0, 1.0 + logit), zero), keepdims=True)


def _abs_sum_kernel(x_ref, y_ref, s_ref):
    @pl.when(pl.program_id(0) == 0)
    def _():
        s_ref[...] = jnp.zeros_like(s_ref)
    s_ref[...] += jnp.sum(jnp.abs(x_ref[...] - y_ref[...]), keepdims=True)


def _abs_sum_weighted_kernel(x_ref, y_ref, w_ref, s_ref, ws_ref, wsum_ref):
    @pl.when(pl.program_id(0) == 0)
    def _():
        s_ref[...] = jnp.zeros_like(s_ref)
        ws_ref[...] = jnp.zeros_like(ws_ref)
        wsum_ref[...] = jnp.zeros_like(wsum_ref)
    rec = jnp.abs(x_ref[...] - y_ref[...])
    w = w_ref[...]
    s_ref[...] += jnp.sum(rec, keepdims=True)
    ws_ref[...] += jnp.sum(w * rec, keepdims=True)
    wsum_ref[...] += jnp.sum(w, keepdims=True)


# ------------------------------ Pallas wrappers -----------------------------

def _gemm_tiles(M, K, N):
    # Lane-dense N tiles up to 512, M tiles up to 512 rows, K tiles up to 512.
    tm = min(512, _round_up(M, 8))
    Mp = _round_up(M, tm)
    tn = min(N, 512)
    tk = min(K, 512)
    assert N % tn == 0 and K % tk == 0, (M, K, N, tm, tn, tk)
    return tm, Mp, tn, tk


def conv_gemm_act(patches, w2, scale, shift, *, act, out_dtype=jnp.bfloat16):
    """o = act((patches @ w2) * scale + shift), gridded over (N, M, K)."""
    M, K = patches.shape
    N = w2.shape[1]
    tm, Mp, tn, tk = _gemm_tiles(M, K, N)
    if Mp != M:
        patches = jnp.pad(patches, ((0, Mp - M), (0, 0)))
    grid = (N // tn, Mp // tm, K // tk)
    out = pl.pallas_call(
        functools.partial(_conv_gemm_act_kernel, act=act),
        grid=grid,
        in_specs=[
            pl.BlockSpec((tm, tk), lambda j, i, k: (i, k)),
            pl.BlockSpec((tk, tn), lambda j, i, k: (k, j)),
            pl.BlockSpec((1, tn), lambda j, i, k: (0, j)),
            pl.BlockSpec((1, tn), lambda j, i, k: (0, j)),
        ],
        out_specs=pl.BlockSpec((tm, tn), lambda j, i, k: (i, j)),
        out_shape=jax.ShapeDtypeStruct((Mp, N), out_dtype),
        scratch_shapes=[pltpu.VMEM((tm, tn), jnp.float32)],
        compiler_params=_cparams(("parallel", "parallel", "arbitrary")),
    )(patches.astype(jnp.bfloat16), w2.astype(jnp.bfloat16),
      scale.reshape(1, N).astype(jnp.float32),
      shift.reshape(1, N).astype(jnp.float32))
    return out[:M]


def conv_gemm_stats(patches, w2, *, out_dtype=jnp.bfloat16):
    """Raw conv GEMM + per-column sum / sum-of-squares (fused BN statistics)."""
    M, K = patches.shape
    N = w2.shape[1]
    tm, Mp, tn, tk = _gemm_tiles(M, K, N)
    if Mp != M:
        patches = jnp.pad(patches, ((0, Mp - M), (0, 0)))  # zero rows: 0 contribution
    grid = (N // tn, Mp // tm, K // tk)
    out, csum, csq = pl.pallas_call(
        _conv_gemm_stats_kernel,
        grid=grid,
        in_specs=[
            pl.BlockSpec((tm, tk), lambda j, i, k: (i, k)),
            pl.BlockSpec((tk, tn), lambda j, i, k: (k, j)),
        ],
        out_specs=(
            pl.BlockSpec((tm, tn), lambda j, i, k: (i, j)),
            pl.BlockSpec((1, tn), lambda j, i, k: (0, j)),
            pl.BlockSpec((1, tn), lambda j, i, k: (0, j)),
        ),
        out_shape=(
            jax.ShapeDtypeStruct((Mp, N), out_dtype),
            jax.ShapeDtypeStruct((1, N), jnp.float32),
            jax.ShapeDtypeStruct((1, N), jnp.float32),
        ),
        scratch_shapes=[pltpu.VMEM((tm, tn), jnp.float32)],
        # M/K axes accumulate into the column-stat outputs -> "arbitrary".
        compiler_params=_cparams(("parallel", "arbitrary", "arbitrary")),
    )(patches.astype(jnp.bfloat16), w2.astype(jnp.bfloat16))
    return out[:M], csum[0], csq[0]


def affine_leaky(x, scale, shift, out_dtype=jnp.bfloat16):
    M, N = x.shape
    tm = min(512, _round_up(M, 8))
    Mp = _round_up(M, tm)
    tn = min(N, 512)   # lane-dense: full channel row whenever N <= 512
    assert N % tn == 0
    if Mp != M:
        x = jnp.pad(x, ((0, Mp - M), (0, 0)))
    out = pl.pallas_call(
        _affine_leaky_kernel,
        grid=(Mp // tm, N // tn),
        in_specs=[
            pl.BlockSpec((tm, tn), lambda i, j: (i, j)),
            pl.BlockSpec((1, tn), lambda i, j: (0, j)),
            pl.BlockSpec((1, tn), lambda i, j: (0, j)),
        ],
        out_specs=pl.BlockSpec((tm, tn), lambda i, j: (i, j)),
        out_shape=jax.ShapeDtypeStruct((Mp, N), out_dtype),
        compiler_params=_cparams(("parallel", "parallel")),
    )(x, scale.reshape(1, N).astype(jnp.float32),
      shift.reshape(1, N).astype(jnp.float32))
    return out[:M]


def final_logit_stats(patches, w_vec, bias):
    """Final 1-channel conv fused with logit mean/hinge sums (never in HBM)."""
    M, K = patches.shape
    tm = min(512, _round_up(M, 8))
    Mp = _round_up(M, tm)
    tk = min(K, 512)
    assert K % tk == 0
    if Mp != M:
        patches = jnp.pad(patches, ((0, Mp - M), (0, 0)))
    scalar = jax.ShapeDtypeStruct((1, 1), jnp.float32)
    s, hr, hf = pl.pallas_call(
        functools.partial(_final_logit_stats_kernel, true_m=M, tm=tm),
        grid=(Mp // tm, K // tk),
        in_specs=[
            pl.BlockSpec((tm, tk), lambda i, k: (i, k)),
            pl.BlockSpec((1, tk), lambda i, k: (0, k)),
            pl.BlockSpec((1, 1), lambda i, k: (0, 0)),
        ],
        out_specs=(pl.BlockSpec((1, 1), lambda i, k: (0, 0)),) * 3,
        out_shape=(scalar, scalar, scalar),
        scratch_shapes=[pltpu.VMEM((tm, 1), jnp.float32)],
        compiler_params=_cparams(("arbitrary", "arbitrary")),
    )(patches.astype(jnp.bfloat16),
      w_vec.reshape(1, K).astype(jnp.float32),
      jnp.reshape(bias, (1, 1)).astype(jnp.float32))
    return s[0, 0], hr[0, 0], hf[0, 0]


def abs_diff_sums(x, y, weights=None, lanes=128, tile_rows=1024):
    """Streaming sums for the rec/NLL losses: sum|x-y| (+ weighted variants)."""
    n = x.size
    rows = _round_up(n, lanes) // lanes
    tr = min(tile_rows, _round_up(rows, 8))
    rows_p = _round_up(rows, tr)
    total = rows_p * lanes

    def prep(a):
        f = a.reshape(-1).astype(jnp.float32)
        return jnp.pad(f, (0, total - n)).reshape(rows_p, lanes)

    xs, ys = prep(x), prep(y)
    grid = (rows_p // tr,)
    scalar = jax.ShapeDtypeStruct((1, 1), jnp.float32)
    row_spec = pl.BlockSpec((tr, lanes), lambda i: (i, 0))
    acc_spec = pl.BlockSpec((1, 1), lambda i: (0, 0))
    cp = _cparams(("arbitrary",))

    if weights is None:
        (s,) = pl.pallas_call(
            _abs_sum_kernel, grid=grid,
            in_specs=[row_spec, row_spec],
            out_specs=(acc_spec,), out_shape=(scalar,),
            compiler_params=cp,
        )(xs, ys)
        return s[0, 0], None, None

    ws = prep(weights)  # zero padding -> zero contribution
    s, wr, wsum = pl.pallas_call(
        _abs_sum_weighted_kernel, grid=grid,
        in_specs=[row_spec, row_spec, row_spec],
        out_specs=(acc_spec,) * 3, out_shape=(scalar,) * 3,
        compiler_params=cp,
    )(xs, ys, ws)
    return s[0, 0], wr[0, 0], wsum[0, 0]


# ------------------------------ conv plumbing --------------------------------

def _im2col_nhwc(x_nhwc, kh, kw, stride, pad):
    """NHWC im2col -> [M = N*OH*OW, K = KH*KW*C]; K order = (dy, dx, ci)."""
    n, h, w, c = x_nhwc.shape
    xp = jnp.pad(x_nhwc, ((0, 0), (pad, pad), (pad, pad), (0, 0)))
    oh = (h + 2 * pad - kh) // stride + 1
    ow = (w + 2 * pad - kw) // stride + 1
    cols = []
    for dy in range(kh):
        for dx in range(kw):
            cols.append(xp[:, dy:dy + stride * oh:stride,
                           dx:dx + stride * ow:stride, :])
    patches = jnp.stack(cols, axis=3)                      # [n, oh, ow, kh*kw, c]
    return patches.reshape(n * oh * ow, kh * kw * c), (n, oh, ow)


def _w_to_gemm(w_oikk):
    """PyTorch [Cout, Cin, KH, KW] -> [K = KH*KW*Cin, Cout] (matches im2col)."""
    cout, cin, kh, kw = w_oikk.shape
    return jnp.transpose(w_oikk, (2, 3, 1, 0)).reshape(kh * kw * cin, cout)


# --------------------------- NLayerDiscriminator -----------------------------

def init_discriminator_params(key, input_nc=3, ndf=64, n_layers=3):
    """weights_init semantics: conv ~ N(0, 0.02); BN gamma ~ N(1, 0.02), beta=0."""
    params = {}
    keys = jax.random.split(key, 2 * (n_layers + 2))
    ki = 0

    def conv_w(k, cout, cin):
        return (0.02 * jax.random.normal(k, (cout, cin, 4, 4))).astype(jnp.float32)

    params["w0"] = conv_w(keys[ki], ndf, input_nc); ki += 1
    params["b0"] = jnp.zeros((ndf,), jnp.float32)
    nf_mult = 1
    for n in range(1, n_layers + 1):
        nf_mult_prev = nf_mult
        nf_mult = min(2 ** n, 8)
        cin, cout = ndf * nf_mult_prev, ndf * nf_mult
        params[f"w{n}"] = conv_w(keys[ki], cout, cin); ki += 1
        params[f"gamma{n}"] = (1.0 + 0.02 * jax.random.normal(keys[ki], (cout,))).astype(jnp.float32); ki += 1
        params[f"beta{n}"] = jnp.zeros((cout,), jnp.float32)
    params["w_out"] = conv_w(keys[ki], 1, ndf * nf_mult); ki += 1
    params["b_out"] = jnp.zeros((1,), jnp.float32)
    return params


def discriminator_logit_stats(params, x_nchw, n_layers=3):
    """NLayerDiscriminator forward fused with logit statistics.

    Returns (sum(logits), sum(relu(1 - logits)), sum(relu(1 + logits)), n_logits).
    """
    # Single layout conversion at the module boundary; NHWC/bf16 everywhere else.
    x = jnp.transpose(x_nchw, (0, 2, 3, 1)).astype(jnp.bfloat16)

    # layer 0: Conv(k4, s2, p1, bias) + LeakyReLU fused in the GEMM epilogue.
    patches, (n, oh, ow) = _im2col_nhwc(x, 4, 4, 2, 1)
    w2 = _w_to_gemm(params["w0"])
    cout = w2.shape[1]
    h = conv_gemm_act(patches, w2, jnp.ones((cout,), jnp.float32),
                      params["b0"], act="leaky")
    h = h.reshape(n, oh, ow, cout)

    # layers 1..n_layers: Conv(bias=False) + BatchNorm(train stats) + LeakyReLU.
    for l in range(1, n_layers + 1):
        stride = 1 if l == n_layers else 2
        patches, (n, oh, ow) = _im2col_nhwc(h, 4, 4, stride, 1)
        w2 = _w_to_gemm(params[f"w{l}"])
        cout = w2.shape[1]
        m_rows = patches.shape[0]                     # true rows (pre-padding)
        conv_out, csum, csq = conv_gemm_stats(patches, w2)
        mean = csum / m_rows
        var = csq / m_rows - mean * mean              # biased variance (BN train)
        scale = params[f"gamma{l}"] / jnp.sqrt(var + BN_EPS)
        shift = params[f"beta{l}"] - mean * scale
        h = affine_leaky(conv_out, scale, shift).reshape(n, oh, ow, cout)

    # final Conv(k4, s1, p1) -> 1 logit channel, fused with mean/hinge sums.
    patches, (n, oh, ow) = _im2col_nhwc(h, 4, 4, 1, 1)
    w2 = _w_to_gemm(params["w_out"])                  # [K, 1]
    s, hr, hf = final_logit_stats(patches, w2[:, 0], params["b_out"])
    return s, hr, hf, n * oh * ow


# ---------------------- GeneralLPIPSWithDiscriminator ------------------------

def adopt_weight(weight, global_step, threshold=0, value=0.0):
    # jnp.where keeps this correct whether global_step is concrete or traced.
    return jnp.where(jnp.asarray(global_step) < threshold, value, weight)


def general_lpips_with_discriminator_forward(
    params, regularization_log, inputs, reconstructions, optimizer_idx,
    global_step, weights=None, split="train",
    disc_start=0, disc_factor=1.0, disc_weight=1.0, regularization_weights=None,
):
    regularization_weights = regularization_weights or {}
    b = inputs.shape[0]
    n_elem = inputs.size

    w_arr = None if weights is None else jnp.broadcast_to(weights, inputs.shape)
    rec_sum, wrec_sum, w_sum = abs_diff_sums(inputs, reconstructions, w_arr)

    lv = jnp.asarray(params["logvar"], jnp.float32)
    inv_exp_lv = jnp.exp(-lv)                         # multiply, not per-elem divide
    nll_sum = rec_sum * inv_exp_lv + lv * n_elem
    if weights is None:
        wnll_sum = nll_sum
    else:
        wnll_sum = wrec_sum * inv_exp_lv + lv * w_sum

    rec_loss_mean = rec_sum / n_elem
    nll_loss = nll_sum / b
    weighted_nll_loss = wnll_sum / b

    disc_factor_eff = adopt_weight(disc_factor, global_step, threshold=disc_start)

    if optimizer_idx == 0:
        s_fake, _, _, m_f = discriminator_logit_stats(params, reconstructions)
        g_loss = -(s_fake / m_f)
        # TODO(synk): adaptive d_weight requires autograd w.r.t. the autoencoder's
        # last layer (not part of this loss module); use the eval fallback 0.0.
        d_weight = jnp.float32(0.0) * disc_weight
        loss = weighted_nll_loss + d_weight * disc_factor_eff * g_loss
        log = {}
        for k, v in regularization_log.items():
            if k in regularization_weights:
                loss = loss + regularization_weights[k] * v
            log[f"{split}/{k}"] = jnp.mean(v)
        log.update({
            f"{split}/total_loss": jnp.mean(loss),
            f"{split}/logvar": lv,
            f"{split}/nll_loss": nll_loss,
            f"{split}/rec_loss": rec_loss_mean,
            f"{split}/d_weight": d_weight,
            f"{split}/disc_factor": jnp.asarray(disc_factor_eff, jnp.float32),
            f"{split}/g_loss": g_loss,
        })
        return loss, log

    if optimizer_idx == 1:
        s_r, hr_r, _, m_r = discriminator_logit_stats(params, inputs)
        s_f, _, hf_f, m_f = discriminator_logit_stats(params, reconstructions)
        d_loss = disc_factor_eff * 0.5 * (hr_r / m_r + hf_f / m_f)   # hinge_d_loss
        log = {
            f"{split}/disc_loss": jnp.mean(d_loss),
            f"{split}/logits_real": s_r / m_r,
            f"{split}/logits_fake": s_f / m_f,
        }
        return d_loss, log

    raise ValueError(f"unknown optimizer_idx {optimizer_idx}")


# ----------------------------------- main ------------------------------------

if __name__ == "__main__":
    key = jax.random.PRNGKey(0)
    k_in, k_rec, k_reg, k_par = jax.random.split(key, 4)

    # disc_in_channels=3, NCHW; H=W=32 -> the 5-layer PatchGAN yields 2x2 logits.
    B, C, H, W = 2, 3, 32, 32
    inputs = jax.random.normal(k_in, (B, C, H, W), jnp.float32)
    reconstructions = inputs + 0.1 * jax.random.normal(k_rec, (B, C, H, W), jnp.float32)

    params = init_discriminator_params(k_par, input_nc=3, ndf=64, n_layers=3)
    params["logvar"] = jnp.float32(0.0)   # logvar_init = 0.0

    regularization_log = {"kl_loss": jnp.abs(jax.random.normal(k_reg, (), jnp.float32))}

    loss_g, log_g = general_lpips_with_discriminator_forward(
        params, regularization_log, inputs, reconstructions,
        optimizer_idx=0, global_step=10, disc_start=0,
        regularization_weights={"kl_loss": 1e-6})

    loss_d, log_d = general_lpips_with_discriminator_forward(
        params, regularization_log, inputs, reconstructions,
        optimizer_idx=1, global_step=10, disc_start=0)

    jax.block_until_ready((loss_g, log_g, loss_d, log_d))
    print("KERNEL_OK")
</pallas_src>

<mosaic_0001>
module attributes {stable_mosaic.version = 11 : i64} {
  func.func @_abs_sum_kernel(%arg0: i32, %arg1: memref<48x128xf32, #tpu.memory_space<vmem>>, %arg2: memref<48x128xf32, #tpu.memory_space<vmem>>, %arg3: memref<1x1xf32, #tpu.memory_space<vmem>>) attributes {dimension_semantics = [#tpu.dimension_semantics<arbitrary>], iteration_bounds = array<i64: 1>, scalar_prefetch = 0 : i64, scratch_operands = 0 : i64, tpu.core_type = #tpu.core_type<tc>, window_params = [{transform_indices = @transform_0, window_bounds = array<i64: 48, 128>}, {transform_indices = @transform_1, window_bounds = array<i64: 48, 128>}, {pipeline_mode = #tpu.pipeline_mode<synchronous>, transform_indices = @transform_2, window_bounds = array<i64: 1, 1>}]} {
    %c0_i32 = arith.constant 0 : i32
    %0 = arith.cmpi eq, %arg0, %c0_i32 : i32
    %1 = arith.extui %0 : i1 to i32
    %c0_i32_0 = arith.constant 0 : i32
    %2 = arith.cmpi ne, %1, %c0_i32_0 : i32
    scf.if %2 {
      %cst_8 = arith.constant 0.000000e+00 : f32
      %15 = vector.broadcast %cst_8 : f32 to vector<1x1xf32>
      %c0_9 = arith.constant 0 : index
      %c0_10 = arith.constant 0 : index
      %16 = vector.load %arg3[%c0_9, %c0_10] : memref<1x1xf32, #tpu.memory_space<vmem>>, vector<1x1xf32>
      tpu.vector_store %arg3[%c0_9, %c0_10], %15 {strides = array<i32>} : memref<1x1xf32, #tpu.memory_space<vmem>>, vector<1x1xf32>,
    } else {
    }
    %c0 = arith.constant 0 : index
    %c0_1 = arith.constant 0 : index
    %3 = vector.load %arg3[%c0, %c0_1] : memref<1x1xf32, #tpu.memory_space<vmem>>, vector<1x1xf32>
    %c0_2 = arith.constant 0 : index
    %c0_3 = arith.constant 0 : index
    %4 = vector.load %arg1[%c0_2, %c0_3] : memref<48x128xf32, #tpu.memory_space<vmem>>, vector<48x128xf32>
    %c0_4 = arith.constant 0 : index
    %c0_5 = arith.constant 0 : index
    %5 = vector.load %arg2[%c0_4, %c0_5] : memref<48x128xf32, #tpu.memory_space<vmem>>, vector<48x128xf32>
    %6 = arith.subf %4, %5 : vector<48x128xf32>
    %7 = math.absf %6 : vector<48x128xf32>
    %8 = vector.shape_cast %7 : vector<48x128xf32> to vector<1x48x128xf32>
    %cst = arith.constant dense<0.000000e+00> : vector<1xf32>
    %9 = vector.multi_reduction <add>, %8, %cst [1, 2] : vector<1x48x128xf32> to vector<1xf32>
    %10 = vector.shape_cast %9 : vector<1xf32> to vector<1x1x1xf32>
    %11 = vector.extract %10[0, 0, 0] : f32 from vector<1x1x1xf32>
    %12 = vector.broadcast %11 : f32 to vector<1x1xf32>
    %13 = arith.addf %3, %12 : vector<1x1xf32>
    %c0_6 = arith.constant 0 : index
    %c0_7 = arith.constant 0 : index
    %14 = vector.load %arg3[%c0_6, %c0_7] : memref<1x1xf32, #tpu.memory_space<vmem>>, vector<1x1xf32>
    tpu.vector_store %arg3[%c0_6, %c0_7], %13 {strides = array<i32>} : memref<1x1xf32, #tpu.memory_space<vmem>>, vector<1x1xf32>,
    return
  }
  func.func @transform_0(%arg0: i32) -> (i32, i32) {
    %c0_i32 = arith.constant 0 : i32
    %c0_i32_0 = arith.constant 0 : i32
    return %arg0, %c0_i32 : i32, i32
  }
  func.func @transform_1(%arg0: i32) -> (i32, i32) {
    %c0_i32 = arith.constant 0 : i32
    %c0_i32_0 = arith.constant 0 : i32
    return %arg0, %c0_i32 : i32, i32
  }
  func.func @transform_2(%arg0: i32) -> (i32, i32) {
    %c0_i32 = arith.constant 0 : i32
    %c0_i32_0 = arith.constant 0 : i32
    %c0_i32_1 = arith.constant 0 : i32
    return %c0_i32, %c0_i32_0 : i32, i32
  }
}

</mosaic_0001>

<bundles_post_ra>
// kernel: tpu_custom_call.1
= control target key start
LH: loop header
LB: loop body
LE: loop exit
PB: predicated region body
PF: predicated region fallthrough
CT: control target
= control target key end

     0   :  { %7 = vsyncpa [#allocation3], 0  ;;  %s244_s0 = inlined_call_operand.hbm [shape: f32[48,128], index: 0, kind: input, shape index: {}]   ;;  %s245_s1 = inlined_call_operand.hbm [shape: f32[48,128], index: 1, kind: input, shape index: {}]   ;;  %s246_s2 = inlined_call_operand.hbm [shape: f32[1,1], index: 2, kind: output, shape index: {}]  }
   0x1   :  { %8 = vsyncpa [#allocation6], 0 }
   0x2   :  { %9 = vsyncpa [#allocation4], 0  ;;  %s185_s9 = smov [#allocation2]   ;;  %s113_s13 = scalar_lea.hbm %s244_s0, 768 }
   0x3   :  { %s15_s10 = sshll.u32 %s185_s9, 4  ;;  %p114_p0 = scmp.ne.s32.totalorder %s244_s0, %s113_s13  ;;  %s16_s10 = int_to_ptr.vmem [resolvable:$true] %s15_s10 }
   0x4   :  { %p117_p1 = scmp.lt.u32.totalorder %s113_s13, %s244_s0 }
   0x6   :  { %p119_p2 = pnand %p117_p1, %p114_p0 }
   0x8   :  { %122 = shalt.err (!%p119_p2)
}
   0x9   :  { %s123_s18 = scalar_lea.vmem %s16_s10, 768  ;;  %p128_p4 = scmp.lt.s32.totalorder %s16_s10, %s16_s10 }
   0xa   :  { %p124_p3 = scmp.ne.s32.totalorder %s16_s10, %s123_s18  ;;  %p129_p5 = scmp.lt.s32.totalorder %s123_s18, %s123_s18 }
   0xc   :  { %p130_p6 = por %p129_p5, %p128_p4 }
   0xe   :  { %p131_p7 = pnand %p130_p6, %p124_p3 }
  0x10   :  { %134 = shalt.err (!%p131_p7)
}
  0x11   :  { %s186_s19 = smov 128   ;;  %s187_s20 = smov 8  }
  0x12   :  { %21 = dma.hbm_to_vmem [thread:$0]  %s244_s0, 768, %s16_s10, [#allocation3], %s186_s19, %s186_s19, %s187_s20  }
  0x13   :  { %s188_s23 = smov [#allocation5]   ;;  %s135_s27 = scalar_lea.hbm %s245_s1, 768 }
  0x14   :  { %s27_s24 = sshll.u32 %s188_s23, 4  ;;  %p136_p8 = scmp.ne.s32.totalorder %s245_s1, %s135_s27  ;;  %s28_s24 = int_to_ptr.vmem [resolvable:$true] %s27_s24 }
  0x15   :  { %p139_p9 = scmp.lt.u32.totalorder %s135_s27, %s245_s1 }
  0x17   :  { %p141_p10 = pnand %p139_p9, %p136_p8 }
  0x19   :  { %144 = shalt.err (!%p141_p10)
}
  0x1a   :  { %s145_s4 = scalar_lea.vmem %s28_s24, 768  ;;  %p150_p12 = scmp.lt.s32.totalorder %s28_s24, %s28_s24 }
  0x1b   :  { %p146_p11 = scmp.ne.s32.totalorder %s28_s24, %s145_s4  ;;  %p151_p13 = scmp.lt.s32.totalorder %s145_s4, %s145_s4 }
  0x1d   :  { %p152_p0 = por %p151_p13, %p150_p12 }
  0x1f   :  { %p153_p1 = pnand %p152_p0, %p146_p11 }
  0x21   :  { %156 = shalt.err (!%p153_p1)
}
  0x22   :  { %33 = dma.hbm_to_vmem [thread:$0]  %s245_s1, 768, %s28_s24, [#allocation6], %s186_s19, %s186_s19, %s187_s20  }
  0x23   :  { %179 = dma.done.wait [#allocation3], 768  }
  0x24   :  { %180 = vsyncadd [#allocation3], 4294966528 }
  0x25   :  { %181 = dma.done.wait [#allocation6], 768  }
  0x26   :  { %182 = vsyncadd [#allocation6], 4294966528  ;;  %v47_v0 = vld [vmem:[#allocation2] sm:$0xff]  ;;  %v48_v1 = vld [vmem:[#allocation2 + $0x8] sm:$0xff]  ;;  %vm44_vm0 = vcmask 0   ;;  %v189_v29 = vmov 0.0  }
  0x27   :  { %v49_v2 = vld [vmem:[#allocation2 + $0x10] sm:$0xff]  ;;  %v50_v3 = vld [vmem:[#allocation2 + $0x18] sm:$0xff]  ;;  %v51_v4 = vld [vmem:[#allocation2 + $0x20] sm:$0xff]  ;;  %45 = vst.msk [vmem:[#allocation7] sm:$0x1] %vm44_vm0, %v189_v29  ;;  %s190_s1 = smov [#allocation7]  }
  0x28   :  { %v53_v5 = vld [vmem:[#allocation5] sm:$0xff]  ;;  %v54_v6 = vld [vmem:[#allocation5 + $0x8] sm:$0xff]  ;;  %v55_v7 = vld [vmem:[#allocation5 + $0x10] sm:$0xff]  ;;  %s95_s6 = sshll.u32 %s190_s1, 4  ;;  %s96_s6 = int_to_ptr.vmem [resolvable:$true] %s95_s6 }
  0x29   :  { %v56_v8 = vld [vmem:[#allocation5 + $0x18] sm:$0xff]  ;;  %v57_v9 = vld [vmem:[#allocation5 + $0x20] sm:$0xff]  ;;  %v59_v10 = vsub.f32 %v47_v0, %v53_v5  ;;  %v60_v11 = vsub.f32 %v48_v1, %v54_v6  ;;  %v61_v12 = vsub.f32 %v49_v2, %v55_v7  ;;  %v58_v14 = vld [vmem:[#allocation5 + $0x28] sm:$0xff]  ;;  %s157_s8 = scalar_lea.vmem %s96_s6, 16  ;;  %s161_s9 = scalar_lea.vmem %s96_s6, 32 }
  0x2a   :  { %v52_v13 = vld [vmem:[#allocation2 + $0x28] sm:$0xff]  ;;  %v62_v15 = vsub.f32 %v50_v3, %v56_v8  ;;  %v63_v16 = vsub.f32 %v51_v4, %v57_v9  ;;  %p158_p2 = scmp.ne.s32.totalorder %s96_s6, %s157_s8  ;;  %p162_p3 = scmp.lt.s32.totalorder %s96_s6, %s96_s6 }
  0x2b   :  { %v65_v17 = vand.u32 2147483647, %v59_v10  ;;  %v66_v18 = vand.u32 2147483647, %v60_v11  ;;  %v67_v19 = vand.u32 2147483647, %v61_v12  ;;  %v64_v20 = vsub.f32 %v52_v13, %v58_v14  ;;  %p163_p4 = scmp.lt.s32.totalorder %s161_s9, %s157_s8 }
  0x2c   :  { %v68_v21 = vand.u32 2147483647, %v62_v15  ;;  %v69_v23 = vand.u32 2147483647, %v63_v16 }
  0x2d   :  { %v71_v22 = vadd.f32 %v66_v18, %v65_v17  ;;  %v70_v25 = vand.u32 2147483647, %v64_v20  ;;  %p164_p5 = por %p163_p4, %p162_p3 }
  0x2e   :  { %v46_v37 = vld [vmem:[#allocation7] sm:$0x1] }
  0x2f   :  { %v72_v24 = vadd.f32 %v71_v22, %v67_v19  ;;  %p165_p6 = pnand %p164_p5, %p158_p2 }
  0x31   :  { %v73_v26 = vadd.f32 %v72_v24, %v68_v21 }
  0x33   :  { %v74_v27 = vadd.f32 %v73_v26, %v69_v23 }
  0x35   :  { %v75_v28 = vadd.f32 %v74_v27, %v70_v25 }
  0x37   :  { %76 = vadd.xlane.f32.xlu0 %v75_v28 }
  0xc4   :  { %v77_v30 = vpop.xlane.xlu0 %76 }
  0xc5   :  { %v78_v31 = vrot.slane %v77_v30, 4 }
  0xc7   :  { %v79_v32 = vadd.f32 %v78_v31, %v77_v30 }
  0xc9   :  { %v80_v33 = vrot.slane %v79_v32, 2 }
  0xcb   :  { %v81_v34 = vadd.f32 %v80_v33, %v79_v32 }
  0xcd   :  { %v82_v35 = vrot.slane %v81_v34, 1 }
  0xcf   :  { %v83_v36 = vadd.f32 %v82_v35, %v81_v34 }
  0xd1   :  { %105 = vpush %v83_v36 }
 0x102   :  { %s106_s7 = spop %105 }
 0x103   :  { %v85_v38 = vstv %s106_s7 }
 0x104   :  { %v86_v39 = vadd.f32 %v85_v38, %v46_v37 }
 0x106   :  { %88 = vst.msk [vmem:[#allocation7] sm:$0x1] %vm44_vm0, %v86_v39 }
 0x107   :  { %168 = shalt.err (!%p165_p6)
}
 0x108   :  { %s169_s12 = scalar_lea.hbm %s246_s2, 16 }
 0x109   :  { %p170_p7 = scmp.ne.s32.totalorder %s246_s2, %s169_s12  ;;  %p173_p8 = scmp.lt.u32.totalorder %s169_s12, %s246_s2 }
 0x10b   :  { %p175_p9 = pnand %p173_p8, %p170_p7 }
 0x10d   :  { %178 = shalt.err (!%p175_p9)
}
 0x10e   :  { %98 = dma.vmem_to_hbm [thread:$0]  %s96_s6, 16, %s246_s2, [#allocation4]  }
 0x10f   :  { %183 = dma.done.wait [#allocation4], 16  }
 0x110   :  { %184 = vsyncadd [#allocation4], 4294967280 }
 0x111   :  { %102 = vsyncpa [#allocation3], 1 }
 0x112   :  { %103 = vsyncpa [#allocation6], 1 }
 0x113   :  { %104 = vsyncpa [#allocation4], 1 }

</bundles_post_ra>
